<compile_context>
chip_gen: v7x
topology: tpu7x:2x2x1
jax: 0.10.0
libtpu: 0.0.40
codegen_flags: <defaults>
</compile_context>

<pallas_src>
import jax
import jax.numpy as jnp
import numpy as np
from jax.experimental import pallas as pl
from jax.experimental.pallas import tpu as pltpu


def _round_up(x, m):
    return (x + m - 1) // m * m


def _softplus(x):
    # Matches torch.nn.functional.softplus (beta=1, threshold=20).
    return jnp.where(x > 20.0, x, jnp.log1p(jnp.exp(x)))


def s6_kernel(x_ref, w_ref, b_ref, y_ref):
    # x_ref: (TM, Dp) in MXU dtype; w_ref: (Dp, Dp+2*Np); b_ref: (1, Dp+2*Np) f32.
    Dp = x_ref.shape[1]
    F = w_ref.shape[1]
    Np = (F - Dp) // 2

    x = x_ref[...]                                                   # (TM, Dp)

    # Single fused matmul: [delta_pre | B | C] = x @ [W1 | W2 | W3] + [b1 | b2 | b3]
    fused = (
        jnp.dot(x, w_ref[...], preferred_element_type=jnp.float32) + b_ref[...]
    )                                                                # (TM, F) f32

    # 128-lane-aligned static slices (no tile-boundary crossing -> no copies).
    delta = _softplus(fused[:, :Dp])                                 # (TM, Dp) EUP
    Bm = fused[:, Dp:Dp + Np]                                        # (TM, Np)
    Cm = fused[:, Dp + Np:]                                          # (TM, Np)

    # dA = exp(delta ⊗ A) multiplies h == 0 in the reference forward, so it
    # contributes nothing to y and is omitted.
    # y[r, d] = x[r, d] * delta[r, d] * sum_n(C[r, n] * B[r, n])
    cb = jnp.sum(Cm * Bm, axis=-1, keepdims=True)                    # (TM, 1) XLU
    y_ref[...] = (x.astype(jnp.float32) * delta * cb).astype(y_ref.dtype)


def s6_forward(x, w1, b1, w2, b2, w3, b3, *, mxu_dtype=jnp.bfloat16, tm_max=512):
    """x: (B, L, D) float32.  w*: (d_in, d_out), b*: (1, d_out)."""
    B, L, D = x.shape
    N = w2.shape[1]
    R = B * L

    Dp = _round_up(D, 128)              # lane-dense feature dim
    Np = _round_up(N, 128)              # lane-aligned B/C segments in the fused RHS
    F = Dp + 2 * Np

    # Balance row tiles: pick the tile count first, then the smallest
    # 8-aligned TM that covers R in that many tiles (minimizes padded rows
    # vs. always using tm_max).
    n_tiles = max(1, pl.cdiv(R, tm_max))
    TM = min(_round_up(pl.cdiv(R, n_tiles), 8), _round_up(tm_max, 8))
    Rp = _round_up(R, TM)

    # Flatten (B, L) -> rows, zero-pad to (Rp, Dp). Padded rows/cols of x are
    # zero so the corresponding outputs are zero; they are sliced off below.
    xp = jnp.zeros((Rp, Dp), mxu_dtype).at[:R, :D].set(
        x.reshape(R, D).astype(mxu_dtype))

    # Fuse W1 | W2 | W3 into one RHS (zero-padded so in-kernel slices are
    # 128-lane-aligned). Bias stays f32 and is added after the f32 accumulation.
    wf = jnp.zeros((Dp, F), mxu_dtype)
    wf = wf.at[:D, :D].set(w1.astype(mxu_dtype))
    wf = wf.at[:D, Dp:Dp + N].set(w2.astype(mxu_dtype))
    wf = wf.at[:D, Dp + Np:Dp + Np + N].set(w3.astype(mxu_dtype))

    bfv = jnp.zeros((1, F), jnp.float32)
    bfv = bfv.at[:, :D].set(b1.astype(jnp.float32))
    bfv = bfv.at[:, Dp:Dp + N].set(b2.astype(jnp.float32))
    bfv = bfv.at[:, Dp + Np:Dp + Np + N].set(b3.astype(jnp.float32))

    grid = (Rp // TM,)

    cost = pl.CostEstimate(
        flops=2 * Rp * Dp * F + 6 * Rp * Dp + 2 * Rp * Np,
        transcendentals=2 * Rp * Dp,                  # softplus exp + log1p
        bytes_accessed=(xp.size * xp.dtype.itemsize
                        + wf.size * wf.dtype.itemsize
                        + bfv.size * 4
                        + Rp * Dp * 4),
    )

    # VMEM budget: double-buffered x/y tiles + resident fused weights/bias.
    # Cap the scoped limit at v7x's 64 MiB physical VMEM.
    # TODO(synk): for very large d_model, give the (grid-invariant) weight
    # spec pipeline_mode=pl.Buffered(1) and/or add a fused-column grid axis.
    est = (2 * (TM * Dp * xp.dtype.itemsize + TM * Dp * 4)   # x / y tiles (x2 buf)
           + 2 * (Dp * F * wf.dtype.itemsize + F * 4))       # weights + bias
    vmem_limit = int(min(64 * 2 ** 20, max(2 * est, 16 * 2 ** 20)))

    yp = pl.pallas_call(
        s6_kernel,
        out_shape=jax.ShapeDtypeStruct((Rp, Dp), jnp.float32),
        grid=grid,
        in_specs=[
            pl.BlockSpec((TM, Dp), lambda i: (i, 0)),   # x row tile
            pl.BlockSpec((Dp, F), lambda i: (0, 0)),    # fused weights (resident)
            pl.BlockSpec((1, F), lambda i: (0, 0)),     # fused bias (resident)
        ],
        out_specs=pl.BlockSpec((TM, Dp), lambda i: (i, 0)),
        compiler_params=pltpu.CompilerParams(
            dimension_semantics=("parallel",),
            vmem_limit_bytes=vmem_limit,
        ),
        cost_estimate=cost,
    )(xp, wf, bfv)

    return yp[:R, :D].reshape(B, L, D).astype(x.dtype)


def s6_reference(x, w1, b1, w2, b2, w3, b3):
    delta = _softplus(x @ w1 + b1)          # (B, L, D)
    Bm = x @ w2 + b2                        # (B, L, N)
    Cm = x @ w3 + b3                        # (B, L, N)
    dB = jnp.einsum('bld,bln->bldn', delta, Bm)
    h = x[..., None] * dB                   # dA * h0 == 0 term dropped (h0 = 0)
    return jnp.einsum('bln,bldn->bld', Cm, h)


def xavier_uniform(key, shape):
    fan_in, fan_out = shape[0], shape[1]
    limit = float(np.sqrt(6.0 / (fan_in + fan_out)))
    return jax.random.uniform(key, shape, jnp.float32, -limit, limit)


if __name__ == "__main__":
    # Small shapes consistent with the module's forward: x is (batch, seq, d_model).
    batch, seq_len, d_model, state_size = 2, 8, 32, 16

    key = jax.random.PRNGKey(0)
    keys = jax.random.split(key, 8)

    x = jax.random.normal(keys[0], (batch, seq_len, d_model), jnp.float32)

    # nn.Linear weights stored pre-transposed as (in, out).
    w1 = xavier_uniform(keys[1], (d_model, d_model))
    b1 = jax.random.uniform(keys[2], (1, d_model), jnp.float32, -0.1, 0.1)
    w2 = xavier_uniform(keys[3], (d_model, state_size))
    b2 = jax.random.uniform(keys[4], (1, state_size), jnp.float32, -0.1, 0.1)
    w3 = xavier_uniform(keys[5], (d_model, state_size))
    b3 = jax.random.uniform(keys[6], (1, state_size), jnp.float32, -0.1, 0.1)
    # A exists in the module but is only consumed via dA * h with h == 0, so it
    # does not affect the forward output.
    _A = xavier_uniform(keys[7], (d_model, state_size))

    y_ref = s6_reference(x, w1, b1, w2, b2, w3, b3)

    # f32 MXU path: faithful to the PyTorch module numerics.
    y_f32 = jax.block_until_ready(
        s6_forward(x, w1, b1, w2, b2, w3, b3, mxu_dtype=jnp.float32))
    np.testing.assert_allclose(np.asarray(y_f32), np.asarray(y_ref),
                               rtol=1e-5, atol=1e-5)

    # bf16 MXU path (perf default): f32 accumulation, looser tolerance.
    y_bf16 = jax.block_until_ready(s6_forward(x, w1, b1, w2, b2, w3, b3))
    np.testing.assert_allclose(np.asarray(y_bf16), np.asarray(y_ref),
                               rtol=5e-2, atol=5e-2)

    print("KERNEL_OK")
</pallas_src>

<mosaic_0001>
module attributes {stable_mosaic.version = 11 : i64} {
  func.func @s6_kernel(%arg0: i32, %arg1: memref<16x128xf32, #tpu.memory_space<vmem>>, %arg2: memref<128x384xf32, #tpu.memory_space<vmem>>, %arg3: memref<1x384xf32, #tpu.memory_space<vmem>>, %arg4: memref<16x128xf32, #tpu.memory_space<vmem>>) attributes {dimension_semantics = [#tpu.dimension_semantics<parallel>], iteration_bounds = array<i64: 1>, scalar_prefetch = 0 : i64, scratch_operands = 0 : i64, tpu.core_type = #tpu.core_type<tc>, window_params = [{transform_indices = @transform_0, window_bounds = array<i64: 16, 128>}, {pipeline_mode = #tpu.pipeline_mode<synchronous>, transform_indices = @transform_1, window_bounds = array<i64: 128, 384>}, {pipeline_mode = #tpu.pipeline_mode<synchronous>, transform_indices = @transform_2, window_bounds = array<i64: 1, 384>}, {transform_indices = @transform_3, window_bounds = array<i64: 16, 128>}]} {
    %c0 = arith.constant 0 : index
    %c0_0 = arith.constant 0 : index
    %0 = vector.load %arg1[%c0, %c0_0] : memref<16x128xf32, #tpu.memory_space<vmem>>, vector<16x128xf32>
    %c0_1 = arith.constant 0 : index
    %c0_2 = arith.constant 0 : index
    %1 = vector.load %arg2[%c0_1, %c0_2] : memref<128x384xf32, #tpu.memory_space<vmem>>, vector<128x384xf32>
    %cst = arith.constant dense<0.000000e+00> : vector<16x384xf32>
    %2 = tpu.matmul %0, %1, %cst {dimension_numbers = #tpu.dot_dimension_numbers<[1], [0], [0], [1], [0, 0, 1, 1], [], []>} : vector<16x128xf32>, vector<128x384xf32>, vector<16x384xf32> -> vector<16x384xf32>
    %c0_3 = arith.constant 0 : index
    %c0_4 = arith.constant 0 : index
    %3 = vector.load %arg3[%c0_3, %c0_4] : memref<1x384xf32, #tpu.memory_space<vmem>>, vector<1x384xf32>
    %4 = vector.broadcast %3 : vector<1x384xf32> to vector<16x384xf32>
    %5 = arith.addf %2, %4 : vector<16x384xf32>
    %6 = vector.extract_strided_slice %5 {offsets = [0, 0], sizes = [16, 128], strides = [1, 1]} : vector<16x384xf32> to vector<16x128xf32>
    %cst_5 = arith.constant 2.000000e+01 : f32
    %7 = vector.broadcast %cst_5 : f32 to vector<16x128xf32>
    %8 = arith.cmpf ogt, %6, %7 : vector<16x128xf32>
    %9 = math.exp %6 : vector<16x128xf32>
    %10 = math.log1p %9 : vector<16x128xf32>
    %11 = arith.select %8, %6, %10 : vector<16x128xi1>, vector<16x128xf32>
    %12 = vector.extract_strided_slice %5 {offsets = [0, 128], sizes = [16, 128], strides = [1, 1]} : vector<16x384xf32> to vector<16x128xf32>
    %13 = vector.extract_strided_slice %5 {offsets = [0, 256], sizes = [16, 128], strides = [1, 1]} : vector<16x384xf32> to vector<16x128xf32>
    %14 = arith.mulf %13, %12 : vector<16x128xf32>
    %cst_6 = arith.constant dense<0.000000e+00> : vector<16xf32>
    %15 = vector.multi_reduction <add>, %14, %cst_6 [1] : vector<16x128xf32> to vector<16xf32>
    %16 = vector.shape_cast %15 : vector<16xf32> to vector<16x1xf32>
    %17 = arith.mulf %0, %11 : vector<16x128xf32>
    %18 = vector.broadcast %16 : vector<16x1xf32> to vector<16x128xf32>
    %19 = arith.mulf %17, %18 : vector<16x128xf32>
    %c0_7 = arith.constant 0 : index
    %c0_8 = arith.constant 0 : index
    %20 = vector.load %arg4[%c0_7, %c0_8] : memref<16x128xf32, #tpu.memory_space<vmem>>, vector<16x128xf32>
    tpu.vector_store %arg4[%c0_7, %c0_8], %19 {strides = array<i32>} : memref<16x128xf32, #tpu.memory_space<vmem>>, vector<16x128xf32>,
    return
  }
  func.func @transform_0(%arg0: i32) -> (i32, i32) {
    %c0_i32 = arith.constant 0 : i32
    %c0_i32_0 = arith.constant 0 : i32
    return %arg0, %c0_i32 : i32, i32
  }
  func.func @transform_1(%arg0: i32) -> (i32, i32) {
    %c0_i32 = arith.constant 0 : i32
    %c0_i32_0 = arith.constant 0 : i32
    %c0_i32_1 = arith.constant 0 : i32
    return %c0_i32, %c0_i32_0 : i32, i32
  }
  func.func @transform_2(%arg0: i32) -> (i32, i32) {
    %c0_i32 = arith.constant 0 : i32
    %c0_i32_0 = arith.constant 0 : i32
    %c0_i32_1 = arith.constant 0 : i32
    return %c0_i32, %c0_i32_0 : i32, i32
  }
  func.func @transform_3(%arg0: i32) -> (i32, i32) {
    %c0_i32 = arith.constant 0 : i32
    %c0_i32_0 = arith.constant 0 : i32
    return %arg0, %c0_i32 : i32, i32
  }
}

</mosaic_0001>

<bundles_post_ra>
// kernel: tpu_custom_call.1
= control target key start
LH: loop header
LB: loop body
LE: loop exit
PB: predicated region body
PF: predicated region fallthrough
CT: control target
= control target key end

     0   :  { %8 = vsyncpa [#allocation3], 0  ;;  %s608_s0 = inlined_call_operand.hbm [shape: f32[16,128], index: 0, kind: input, shape index: {}]   ;;  %s609_s1 = inlined_call_operand.hbm [shape: f32[128,384], index: 1, kind: input, shape index: {}]   ;;  %s610_s2 = inlined_call_operand.vmem [shape: f32[1,384], index: 2, kind: input, shape index: {}]   ;;  %s611_s3 = inlined_call_operand.hbm [shape: f32[16,128], index: 3, kind: output, shape index: {}]  }
   0x1   :  { %9 = vsyncpa [#allocation6], 0 }
   0x2   :  { %10 = vsyncpa [#allocation4], 0  ;;  %s523_s12 = smov [#allocation2]   ;;  %s451_s16 = scalar_lea.hbm %s608_s0, 256 }
   0x3   :  { %s16_s13 = sshll.u32 %s523_s12, 4  ;;  %p452_p0 = scmp.ne.s32.totalorder %s608_s0, %s451_s16  ;;  %s17_s13 = int_to_ptr.vmem [resolvable:$true] %s16_s13 }
   0x4   :  { %p455_p1 = scmp.lt.u32.totalorder %s451_s16, %s608_s0 }
   0x6   :  { %p457_p2 = pnand %p455_p1, %p452_p0 }
   0x8   :  { %460 = shalt.err (!%p457_p2)
}
   0x9   :  { %s461_s21 = scalar_lea.vmem %s17_s13, 256  ;;  %p466_p4 = scmp.lt.s32.totalorder %s17_s13, %s17_s13 }
   0xa   :  { %p462_p3 = scmp.ne.s32.totalorder %s17_s13, %s461_s21  ;;  %p467_p5 = scmp.lt.s32.totalorder %s461_s21, %s461_s21 }
   0xc   :  { %p468_p6 = por %p467_p5, %p466_p4 }
   0xe   :  { %p469_p7 = pnand %p468_p6, %p462_p3 }
  0x10   :  { %472 = shalt.err (!%p469_p7)
}
  0x11   :  { %s524_s22 = smov 128   ;;  %s525_s23 = smov 8  }
  0x12   :  { %22 = dma.hbm_to_vmem [thread:$0]  %s608_s0, 256, %s17_s13, [#allocation3], %s524_s22, %s524_s22, %s525_s23  }
  0x13   :  { %s526_s26 = smov [#allocation5]   ;;  %s473_s30 = scalar_lea.hbm %s609_s1, 6144 }
  0x14   :  { %s28_s27 = sshll.u32 %s526_s26, 4  ;;  %p474_p8 = scmp.ne.s32.totalorder %s609_s1, %s473_s30  ;;  %s29_s27 = int_to_ptr.vmem [resolvable:$true] %s28_s27 }
  0x15   :  { %p477_p9 = scmp.lt.u32.totalorder %s473_s30, %s609_s1 }
  0x17   :  { %p479_p10 = pnand %p477_p9, %p474_p8 }
  0x19   :  { %482 = shalt.err (!%p479_p10)
}
  0x1a   :  { %s483_s8 = scalar_lea.vmem %s29_s27, 6144  ;;  %p488_p12 = scmp.lt.s32.totalorder %s29_s27, %s29_s27 }
  0x1b   :  { %p484_p11 = scmp.ne.s32.totalorder %s29_s27, %s483_s8  ;;  %p489_p13 = scmp.lt.s32.totalorder %s483_s8, %s483_s8 }
  0x1d   :  { %p490_p0 = por %p489_p13, %p488_p12 }
  0x1f   :  { %p491_p1 = pnand %p490_p0, %p484_p11 }
  0x21   :  { %494 = shalt.err (!%p491_p1)
}
  0x22   :  { %s527_s0 = smov 384   ;;  %s528_s9 = smov 24  }
  0x23   :  { %34 = dma.hbm_to_vmem [thread:$0]  %s609_s1, 6144, %s29_s27, [#allocation6], %s527_s0, %s527_s0, %s528_s9  }
  0x24   :  { %517 = dma.done.wait [#allocation3], 256  }
  0x25   :  { %518 = vsyncadd [#allocation3], 4294967040 }
  0x26   :  { %519 = dma.done.wait [#allocation6], 6144  }
  0x27   :  { %520 = vsyncadd [#allocation6], 4294961152  ;;  %v529_v0 = vmov 0.0   ;;  %v46_v1 = vld [vmem:[#allocation5 + $0x8] sm:$0xff]  ;;  %v49_v2 = vld [vmem:[#allocation5 + $0x20] sm:$0xff] }
  0x28   :  { %174 = vmatprep.mubr.f32.mxu0 %v529_v0  ;;  %v47_v3 = vld [vmem:[#allocation5 + $0x10] sm:$0xff]  ;;  %v371_v4 = vpack.c.bf16 %v49_v2, %v46_v1  ;;  %v50_v5 = vld [vmem:[#allocation5 + $0x28] sm:$0xff]  ;;  %v45_v6 = vld [vmem:[#allocation5] sm:$0xff] }
  0x29   :  { %v48_v7 = vld [vmem:[#allocation5 + $0x18] sm:$0xff]  ;;  %v403_v8 = vpack.c.bf16 %v50_v5, %v47_v3  ;;  %v55_v11 = vld [vmem:[#allocation5 + $0x50] sm:$0xff]  ;;  %v53_v12 = vld [vmem:[#allocation5 + $0x40] sm:$0xff] }
  0x2a   :  { %v373_v9 = vpack.c.bf16 %v48_v7, %v45_v6  ;;  %v52_v10 = vld [vmem:[#allocation5 + $0x38] sm:$0xff]  ;;  %372 = vmatprep.subr.bf16.mxu0 %v371_v4  ;;  %v51_v15 = vld [vmem:[#allocation5 + $0x30] sm:$0xff]  ;;  %v54_v16 = vld [vmem:[#allocation5 + $0x48] sm:$0xff] }
  0x2b   :  { %v375_v13 = vpack.c.bf16 %v55_v11, %v52_v10  ;;  %v56_v14 = vld [vmem:[#allocation5 + $0x58] sm:$0xff]  ;;  %404 = vmatprep.subr.bf16.mxu1 %v403_v8  ;;  %v377_v18 = vpack.c.bf16 %v54_v16, %v51_v15  ;;  %v58_v19 = vld [vmem:[#allocation5 + $0x68] sm:$0xff]  ;;  %v61_v20 = vld [vmem:[#allocation5 + $0x80] sm:$0xff] }
  0x2c   :  { %374 = vmatpush1.bf16.msra.mxu0 %v373_v9  ;;  %v407_v17 = vpack.c.bf16 %v56_v14, %v53_v12  ;;  %v59_v21 = vld [vmem:[#allocation5 + $0x70] sm:$0xff]  ;;  %406 = vmatpush3.bf16.msra.mxu1 %v403_v8  ;;  %v379_v22 = vpack.c.bf16 %v61_v20, %v58_v19  ;;  %v62_v23 = vld [vmem:[#allocation5 + $0x88] sm:$0xff]  ;;  %v57_v24 = vld [vmem:[#allocation5 + $0x60] sm:$0xff]  ;;  %v95_v12 = vlaneseq }
  0x2d   :  { %376 = vmatprep.subr.bf16.mxu0 %v375_v13  ;;  %v60_v25 = vld [vmem:[#allocation5 + $0x78] sm:$0xff]  ;;  %v411_v26 = vpack.c.bf16 %v62_v23, %v59_v21  ;;  %v67_v28 = vld [vmem:[#allocation5 + $0xb0] sm:$0xff]  ;;  %v65_v29 = vld [vmem:[#allocation5 + $0xa0] sm:$0xff] }
  0x2e   :  { %408 = vmatprep.subr.bf16.mxu1 %v407_v17  ;;  %v64_v27 = vld [vmem:[#allocation5 + $0x98] sm:$0xff]  ;;  %v381_v31 = vpack.c.bf16 %v60_v25, %v57_v24  ;;  %v63_v33 = vld [vmem:[#allocation5 + $0x90] sm:$0xff]  ;;  %v66_v34 = vld [vmem:[#allocation5 + $0xa8] sm:$0xff]  ;;  %v96_v13 = vshrl.u32 %v95_v12, 7 }
  0x2f   :  { %v68_v30 = vld [vmem:[#allocation5 + $0xb8] sm:$0xff]  ;;  %v383_v32 = vpack.c.bf16 %v67_v28, %v64_v27  ;;  %v70_v36 = vld [vmem:[#allocation5 + $0xc8] sm:$0xff]  ;;  %v73_v37 = vld [vmem:[#allocation5 + $0xe0] sm:$0xff]  ;;  %v385_v40 = vpack.c.bf16 %v66_v34, %v63_v33 }
  0x30   :  { %378 = vmatpush1.bf16.msra.mxu0 %v377_v18  ;;  %410 = vmatpush3.bf16.msra.mxu1 %v407_v17  ;;  %v415_v35 = vpack.c.bf16 %v68_v30, %v65_v29  ;;  %v71_v38 = vld [vmem:[#allocation5 + $0xd0] sm:$0xff]  ;;  %v74_v39 = vld [vmem:[#allocation5 + $0xe8] sm:$0xff]  ;;  %v387_v41 = vpack.c.bf16 %v73_v37, %v70_v36  ;;  %v69_v42 = vld [vmem:[#allocation5 + $0xc0] sm:$0xff]  ;;  %v101_v14 = vsub.s32 1, %v96_v13  ;;  %v105_v16 = vsub.s32 2, %v96_v13 }
  0x31   :  { %380 = vmatprep.subr.bf16.mxu0 %v379_v22  ;;  %412 = vmatprep.subr.bf16.mxu1 %v411_v26  ;;  %v72_v43 = vld [vmem:[#allocation5 + $0xd8] sm:$0xff]  ;;  %v419_v44 = vpack.c.bf16 %v74_v39, %v71_v38  ;;  %v79_v46 = vld [vmem:[#allocation5 + $0x110] sm:$0xff]  ;;  %v77_v47 = vld [vmem:[#allocation5 + $0x100] sm:$0xff]  ;;  %v97_v30 = vsub.s32 0, %v96_v13 }
  0x32   :  { %v76_v45 = vld [vmem:[#allocation5 + $0xf8] sm:$0xff]  ;;  %v389_v49 = vpack.c.bf16 %v72_v43, %v69_v42  ;;  %v579_v50 = vld [vmem:[#allocation2] sm:$0xff]  ;;  %v78_v53 = vld [vmem:[#allocation5 + $0x108] sm:$0xff] }
  0x33   :  { %v80_v48 = vld [vmem:[#allocation5 + $0x118] sm:$0xff]  ;;  %v391_v51 = vpack.c.bf16 %v79_v46, %v76_v45  ;;  %v75_v52 = vld [vmem:[#allocation5 + $0xf0] sm:$0xff]  ;;  %v82_v55 = vld [vmem:[#allocation5 + $0x128] sm:$0xff]  ;;  %368 = vmatprep.mubr.f32.mxu1 %v579_v50 }
  0x34   :  { %382 = vmatpush1.bf16.msra.mxu0 %v381_v31  ;;  %414 = vmatpush3.bf16.msra.mxu1 %v411_v26  ;;  %v423_v54 = vpack.c.bf16 %v80_v48, %v77_v47  ;;  %v85_v56 = vld [vmem:[#allocation5 + $0x140] sm:$0xff]  ;;  %v83_v57 = vld [vmem:[#allocation5 + $0x130] sm:$0xff]  ;;  %v86_v58 = vld [vmem:[#allocation5 + $0x148] sm:$0xff]  ;;  %v393_v59 = vpack.c.bf16 %v78_v53, %v75_v52 }
  0x35   :  { %384 = vmatprep.subr.bf16.mxu0 %v383_v32  ;;  %416 = vmatprep.subr.bf16.mxu1 %v415_v35  ;;  %v395_v60 = vpack.c.bf16 %v85_v56, %v82_v55  ;;  %v81_v61 = vld [vmem:[#allocation5 + $0x120] sm:$0xff]  ;;  %v84_v62 = vld [vmem:[#allocation5 + $0x138] sm:$0xff]  ;;  %v427_v63 = vpack.c.bf16 %v86_v58, %v83_v57  ;;  %v91_v2 = vld [vmem:[#allocation5 + $0x170] sm:$0xff] }
  0x36   :  { %v88_v1 = vld [vmem:[#allocation5 + $0x158] sm:$0xff]  ;;  %v89_v3 = vld [vmem:[#allocation5 + $0x160] sm:$0xff]  ;;  %v397_v5 = vpack.c.bf16 %v84_v62, %v81_v61  ;;  %v87_v7 = vld [vmem:[#allocation5 + $0x150] sm:$0xff] }
  0x37   :  { %v92_v4 = vld [vmem:[#allocation5 + $0x178] sm:$0xff]  ;;  %v399_v6 = vpack.c.bf16 %v91_v2, %v88_v1  ;;  %v90_v8 = vld [vmem:[#allocation5 + $0x168] sm:$0xff]  ;;  %v93_v15 = vld [vmem:[%s610_s2] sm:$0x7]  ;;  %s530_s2 = smov [#allocation7]  }
  0x38   :  { %386 = vmatpush1.bf16.msra.mxu0 %v385_v40  ;;  %418 = vmatpush3.bf16.msra.mxu1 %v415_v35  ;;  %v431_v9 = vpack.c.bf16 %v92_v4, %v89_v3  ;;  %v401_v10 = vpack.c.bf16 %v90_v8, %v87_v7  ;;  %v582_v11 = vld [vmem:[#allocation2 + $0x8] sm:$0xff]  ;;  %v102_v17 = vrot.slane %v93_v15, %v101_v14  ;;  %s305_s13 = sshll.u32 %s530_s2, 4  ;;  %s306_s13 = int_to_ptr.vmem [resolvable:$true] %s305_s13 }
  0x39   :  { %388 = vmatprep.subr.bf16.mxu0 %v387_v41  ;;  %420 = vmatprep.subr.bf16.mxu1 %v419_v44  ;;  %v106_v18 = vrot.slane %v93_v15, %v105_v16  ;;  %v98_v31 = vrot.slane %v93_v15, %v97_v30  ;;  %s495_s14 = scalar_lea.vmem %s306_s13, 256  ;;  %p500_p3 = scmp.lt.s32.totalorder %s306_s13, %s306_s13 }
  0x3a   :  { %p496_p2 = scmp.ne.s32.totalorder %s306_s13, %s495_s14  ;;  %p501_p4 = scmp.lt.s32.totalorder %s495_s14, %s495_s14 }
  0x3c   :  { %390 = vmatpush1.bf16.msra.mxu0 %v389_v49  ;;  %422 = vmatpush3.bf16.msra.mxu1 %v419_v44  ;;  %p502_p5 = por %p501_p4, %p500_p3 }
  0x3d   :  { %392 = vmatprep.subr.bf16.mxu0 %v391_v51  ;;  %424 = vmatprep.subr.bf16.mxu1 %v423_v54 }
  0x3e   :  { %p503_p6 = pnand %p502_p5, %p496_p2 }
  0x40   :  { %394 = vmatpush1.bf16.msra.mxu0 %v393_v59  ;;  %426 = vmatpush3.bf16.msra.mxu1 %v423_v54 }
  0x41   :  { %396 = vmatprep.subr.bf16.mxu0 %v395_v60  ;;  %428 = vmatprep.subr.bf16.mxu1 %v427_v63 }
  0x44   :  { %398 = vmatpush1.bf16.msra.mxu0 %v397_v5  ;;  %430 = vmatpush3.bf16.msra.mxu1 %v427_v63 }
  0x45   :  { %400 = vmatprep.subr.bf16.mxu0 %v399_v6  ;;  %432 = vmatprep.subr.bf16.mxu1 %v431_v9 }
  0x48   :  { %402 = vmatpush1.bf16.msra.mxu0 %v401_v10  ;;  %434 = vmatpush3.bf16.msra.mxu1 %v431_v9 }
  0x4b   :  { %175 = vmatmul.mubr.f32.vlgmr.msra.gmra.mrb[0].mxu0 %v579_v50  ;;  %369 = vmatmul.mubr.f32.vlgmr.msra.gmra.mrb[0].mxu1 %v582_v11 }
  0x4c   :  { %180 = vmatprep.mubr.f32.mxu0 %v529_v0 }
  0x4f   :  { %181 = vmatmul.mubr.f32.gmra.mrb[2].mxu0 %v582_v11 }
 0x11e   :  { %v176_v19 = vpop.f32.mrb[0].mxu0  ;;  %v370_v20 = vpop.f32.mrb[0].mxu1 }
 0x11f   :  { %v178_v21 = vpop.f32.mrb[1].mxu0  ;;  %v253_v23 = vpop.f32.mrb[1].mxu1  ;;  %v259_v27 = vadd.f32 %v370_v20, %v106_v18  ;;  %v177_v32 = vadd.f32 %v176_v19, %v98_v31 }
 0x120   :  { %v179_v22 = vadd.f32 %v178_v21, %v102_v17  ;;  %v254_v24 = vadd.f32 %v253_v23, %v106_v18 }
 0x121   :  { %v264_v33 = vmul.f32 1.442695, %v177_v32  ;;  %vm262_vm1 = vcmp.gt.f32.partialorder %v177_v32, 20.0 }
 0x122   :  { %v182_v25 = vpop.f32.mrb[2].mxu0  ;;  %v288_v26 = vmul.f32 %v254_v24, %v179_v22 }
 0x123   :  { %v184_v0 = vpop.f32.mrb[3].mxu0  ;;  %v183_v34 = vadd.f32 %v182_v25, %v98_v31  ;;  %443 = vpow2.f32 %v264_v33 }
 0x124   :  { %v185_v28 = vadd.f32 %v184_v0, %v102_v17  ;;  %290 = vadd.xlane.f32.xlu0 %v288_v26 }
 0x125   :  { %v266_v35 = vmul.f32 1.442695, %v183_v34  ;;  %vm263_vm3 = vcmp.gt.f32.partialorder %v183_v34, 20.0 }
 0x126   :  { %v289_v29 = vmul.f32 %v259_v27, %v185_v28 }
 0x127   :  { %445 = vpow2.f32 %v266_v35 }
 0x128   :  { %292 = vadd.xlane.f32.xlu0 %v289_v29 }
 0x12d   :  { %v444_v36 = vpop.eup %443 }
 0x12e   :  { %v268_v37 = vadd.f32 1.0, %v444_v36  ;;  %v271_v40 = vmul.f32 -0.5, %v444_v36  ;;  %v274_v44 = vand.u32 2147483647, %v444_v36 }
 0x130   :  { %447 = vlog2.f32 %v268_v37  ;;  %v272_v42 = vadd.f32 1.0, %v271_v40  ;;  %vm275_vm0 = vcmp.lt.f32.partialorder %v274_v44, 0.0004427343 }
 0x131   :  { %v446_v38 = vpop.eup %445 }
 0x132   :  { %v277_v39 = vadd.f32 1.0, %v446_v38  ;;  %v280_v43 = vmul.f32 -0.5, %v446_v38  ;;  %v273_v47 = vmul.f32 %v444_v36, %v272_v42  ;;  %v283_v49 = vand.u32 2147483647, %v446_v38 }
 0x134   :  { %449 = vlog2.f32 %v277_v39  ;;  %v281_v48 = vadd.f32 1.0, %v280_v43  ;;  %vm284_vm2 = vcmp.lt.f32.partialorder %v283_v49, 0.0004427343 }
 0x136   :  { %v282_v53 = vmul.f32 %v446_v38, %v281_v48 }
 0x13a   :  { %v448_v41 = vpop.eup %447 }
 0x13b   :  { %v270_v45 = vmul.f32 0.6931472, %v448_v41 }
 0x13d   :  { %v276_v51 = vsel %vm275_vm0, %v273_v47, %v270_v45 }
 0x13e   :  { %v450_v46 = vpop.eup %449  ;;  %v286_v54 = vsel %vm262_vm1, %v177_v32, %v276_v51 }
 0x13f   :  { %v279_v52 = vmul.f32 0.6931472, %v450_v46  ;;  %v294_v56 = vmul.f32 %v286_v54, %v579_v50 }
 0x141   :  { %v285_v55 = vsel %vm284_vm2, %v282_v53, %v279_v52 }
 0x142   :  { %v287_v58 = vsel %vm263_vm3, %v183_v34, %v285_v55 }
 0x143   :  { %v295_v60 = vmul.f32 %v287_v58, %v582_v11 }
 0x1b1   :  { %v291_v57 = vpop.xlane.xlu0 %290 }
 0x1b2   :  { %v296_v59 = vmul.f32 %v294_v56, %v291_v57 }
 0x1b4   :  { %298 = vst [vmem:[#allocation7] sm:$0xff] %v296_v59 }
 0x1b5   :  { %v293_v61 = vpop.xlane.xlu0 %292 }
 0x1b6   :  { %v297_v62 = vmul.f32 %v295_v60, %v293_v61 }
 0x1b8   :  { %299 = vst [vmem:[#allocation7 + $0x8] sm:$0xff] %v297_v62 }
 0x1b9   :  { %506 = shalt.err (!%p503_p6)
}
 0x1ba   :  { %s507_s17 = scalar_lea.hbm %s611_s3, 256 }
 0x1bb   :  { %p508_p7 = scmp.ne.s32.totalorder %s611_s3, %s507_s17  ;;  %p511_p8 = scmp.lt.u32.totalorder %s507_s17, %s611_s3 }
 0x1bd   :  { %p513_p9 = pnand %p511_p8, %p508_p7 }
 0x1bf   :  { %516 = shalt.err (!%p513_p9)
}
 0x1c0   :  { %311 = dma.vmem_to_hbm [thread:$0]  %s306_s13, 256, %s611_s3, [#allocation4], %s524_s22, %s524_s22, %s525_s23  }
 0x1c1   :  { %521 = dma.done.wait [#allocation4], 256  }
 0x1c2   :  { %522 = vsyncadd [#allocation4], 4294967040 }
 0x1c3   :  { %315 = vsyncpa [#allocation3], 1 }
 0x1c4   :  { %316 = vsyncpa [#allocation6], 1 }
 0x1c5   :  { %317 = vsyncpa [#allocation4], 1 }

</bundles_post_ra>
